<compile_context>
chip_gen: v5e
topology: v5e:2x2
jax: 0.10.0
libtpu: 0.0.40
codegen_flags: <defaults>
</compile_context>

<pallas_src>
import jax
import jax.numpy as jnp
from jax.experimental import pallas as pl
from jax.experimental.pallas import tpu as pltpu


def _round_up(x, m):
    return ((x + m - 1) // m) * m


def decoder_kernel(z_ref, w1_ref, b1_ref, w2_ref, b2_ref, out_ref):
    # Hoist loop-invariant bias reads (once per block, before the dots).
    b1 = b1_ref[...]                                   # [1, Hp]  (f32)
    b2 = b2_ref[...]                                   # [1, Xp]  (f32)

    # linear1 + LeakyReLU(0.01); MXU accumulates in f32.
    h = jnp.dot(z_ref[...], w1_ref[...], preferred_element_type=jnp.float32)
    h = h + b1                                         # [TB,Hp] + [1,Hp] broadcast
    h = jnp.where(h >= 0.0, h, 0.01 * h)

    # output linear + sigmoid (epilogue stays in f32).
    o = jnp.dot(h.astype(w2_ref.dtype), w2_ref[...],
                preferred_element_type=jnp.float32)
    o = o + b2                                         # [TB,Xp] + [1,Xp] broadcast
    out_ref[...] = jax.nn.sigmoid(o).astype(out_ref.dtype)


def decoder_forward(z, w1, b1, w2, b2, *, tb=512, mxu_dtype=None):
    """z: [B, z_dim]; w1: [z_dim, H]; b1: [1, H]; w2: [H, X]; b2: [1, X].

    tb:        target batch-tile rows (rounded to a multiple of 8, capped at B).
    mxu_dtype: optional dtype (e.g. jnp.bfloat16) for the matmul inputs on
               v6e/v7x; epilogue math stays f32 either way.
    """
    B, z_dim = z.shape
    H = w1.shape[1]
    X = w2.shape[1]

    # --- lane-dense hidden: pad H to a multiple of 128 (zero cols/rows/bias).
    # leaky_relu(0 + 0) = 0 and the padded W2 rows are zero, so this is exact.
    H_pad = _round_up(H, 128)
    if H_pad != H:
        w1 = jnp.pad(w1, ((0, 0), (0, H_pad - H)))
        b1 = jnp.pad(b1, ((0, 0), (0, H_pad - H)))
        w2 = jnp.pad(w2, ((0, H_pad - H), (0, 0)))

    # --- lane-dense output: pad X to a multiple of 128 (zero weights/bias) ---
    X_pad = _round_up(X, 128)
    if X_pad != X:
        w2 = jnp.pad(w2, ((0, 0), (0, X_pad - X)))
        b2 = jnp.pad(b2, ((0, 0), (0, X_pad - X)))

    # --- batch tile: multiple of 8 sublanes, capped at `tb`; pad B to a multiple
    TB = min(_round_up(B, 8), _round_up(tb, 8))
    B_pad = _round_up(B, TB)
    if B_pad != B:
        z = jnp.pad(z, ((0, B_pad - B), (0, 0)))

    # --- optional bf16 MXU inputs (v6e / v7x fast path) ---
    if mxu_dtype is not None:
        z = z.astype(mxu_dtype)
        w1 = w1.astype(mxu_dtype)
        w2 = w2.astype(mxu_dtype)

    grid = (B_pad // TB,)

    itemsize = lambda a: a.size * a.dtype.itemsize
    cost = pl.CostEstimate(
        flops=2 * B_pad * (z_dim * H_pad + H_pad * X_pad),
        transcendentals=B_pad * X_pad,                 # sigmoid exp per element
        bytes_accessed=(itemsize(z) + itemsize(w1) + itemsize(b1)
                        + itemsize(w2) + itemsize(b2)
                        + B_pad * X_pad * 4),
    )

    out = pl.pallas_call(
        decoder_kernel,
        out_shape=jax.ShapeDtypeStruct((B_pad, X_pad), jnp.float32),
        grid=grid,
        in_specs=[
            pl.BlockSpec((TB, z_dim), lambda i: (i, 0)),      # batch-tiled z
            pl.BlockSpec((z_dim, H_pad), lambda i: (0, 0)),   # resident W1 (padded)
            pl.BlockSpec((1, H_pad), lambda i: (0, 0)),       # resident b1 (padded)
            pl.BlockSpec((H_pad, X_pad), lambda i: (0, 0)),   # resident W2 (padded)
            pl.BlockSpec((1, X_pad), lambda i: (0, 0)),       # resident b2 (padded)
        ],
        out_specs=pl.BlockSpec((TB, X_pad), lambda i: (i, 0)),
        compiler_params=pltpu.CompilerParams(
            dimension_semantics=("parallel",),                # 2-TC sharding on v7x
        ),
        cost_estimate=cost,
    )(z, w1, b1, w2, b2)

    return out[:B, :X]


def init_params(key, z_dim, hidden_dim, x_dim):
    """Deterministic init mimicking torch.nn.Linear default (uniform +/- 1/sqrt(fan_in))."""
    k1, k2, k3, k4 = jax.random.split(key, 4)
    bound1 = 1.0 / (z_dim ** 0.5)
    bound2 = 1.0 / (hidden_dim ** 0.5)
    w1 = jax.random.uniform(k1, (z_dim, hidden_dim), jnp.float32, -bound1, bound1)
    b1 = jax.random.uniform(k2, (1, hidden_dim), jnp.float32, -bound1, bound1)
    w2 = jax.random.uniform(k3, (hidden_dim, x_dim), jnp.float32, -bound2, bound2)
    b2 = jax.random.uniform(k4, (1, x_dim), jnp.float32, -bound2, bound2)
    return w1, b1, w2, b2


def reference_forward(z, w1, b1, w2, b2):
    h = z @ w1 + b1
    h = jnp.where(h >= 0.0, h, 0.01 * h)
    return jax.nn.sigmoid(h @ w2 + b2)


if __name__ == "__main__":
    key = jax.random.PRNGKey(0)
    z_dim, hidden_dim, x_dim = 8, 32, 64
    batch = 8

    kz, kp = jax.random.split(key)
    z = jax.random.normal(kz, (batch, z_dim), jnp.float32)
    w1, b1, w2, b2 = init_params(kp, z_dim, hidden_dim, x_dim)

    # f32 MXU inputs by default (tight numeric match with the reference);
    # pass mxu_dtype=jnp.bfloat16 on v6e/v7x for the bf16 fast path.
    x_hat = decoder_forward(z, w1, b1, w2, b2)
    jax.block_until_ready(x_hat)

    ref = reference_forward(z, w1, b1, w2, b2)
    assert x_hat.shape == (batch, x_dim)
    assert jnp.allclose(x_hat, ref, atol=1e-5, rtol=1e-5)

    print("KERNEL_OK")
</pallas_src>

<mosaic_0001>
module attributes {stable_mosaic.version = 11 : i64} {
  func.func @decoder_kernel(%arg0: i32, %arg1: memref<8x8xf32, #tpu.memory_space<vmem>>, %arg2: memref<8x128xf32, #tpu.memory_space<vmem>>, %arg3: memref<1x128xf32, #tpu.memory_space<vmem>>, %arg4: memref<128x128xf32, #tpu.memory_space<vmem>>, %arg5: memref<1x128xf32, #tpu.memory_space<vmem>>, %arg6: memref<8x128xf32, #tpu.memory_space<vmem>>) attributes {dimension_semantics = [#tpu.dimension_semantics<parallel>], iteration_bounds = array<i64: 1>, scalar_prefetch = 0 : i64, scratch_operands = 0 : i64, tpu.core_type = #tpu.core_type<tc>, window_params = [{transform_indices = @transform_0, window_bounds = array<i64: 8, 8>}, {pipeline_mode = #tpu.pipeline_mode<synchronous>, transform_indices = @transform_1, window_bounds = array<i64: 8, 128>}, {pipeline_mode = #tpu.pipeline_mode<synchronous>, transform_indices = @transform_2, window_bounds = array<i64: 1, 128>}, {pipeline_mode = #tpu.pipeline_mode<synchronous>, transform_indices = @transform_3, window_bounds = array<i64: 128, 128>}, {pipeline_mode = #tpu.pipeline_mode<synchronous>, transform_indices = @transform_4, window_bounds = array<i64: 1, 128>}, {transform_indices = @transform_5, window_bounds = array<i64: 8, 128>}]} {
    %c0 = arith.constant 0 : index
    %c0_0 = arith.constant 0 : index
    %0 = vector.load %arg3[%c0, %c0_0] : memref<1x128xf32, #tpu.memory_space<vmem>>, vector<1x128xf32>
    %c0_1 = arith.constant 0 : index
    %c0_2 = arith.constant 0 : index
    %1 = vector.load %arg5[%c0_1, %c0_2] : memref<1x128xf32, #tpu.memory_space<vmem>>, vector<1x128xf32>
    %c0_3 = arith.constant 0 : index
    %c0_4 = arith.constant 0 : index
    %2 = vector.load %arg1[%c0_3, %c0_4] : memref<8x8xf32, #tpu.memory_space<vmem>>, vector<8x8xf32>
    %c0_5 = arith.constant 0 : index
    %c0_6 = arith.constant 0 : index
    %3 = vector.load %arg2[%c0_5, %c0_6] : memref<8x128xf32, #tpu.memory_space<vmem>>, vector<8x128xf32>
    %cst = arith.constant dense<0.000000e+00> : vector<8x128xf32>
    %4 = tpu.matmul %2, %3, %cst {dimension_numbers = #tpu.dot_dimension_numbers<[1], [0], [0], [1], [0, 0, 1, 1], [], []>} : vector<8x8xf32>, vector<8x128xf32>, vector<8x128xf32> -> vector<8x128xf32>
    %5 = vector.broadcast %0 : vector<1x128xf32> to vector<8x128xf32>
    %6 = arith.addf %4, %5 : vector<8x128xf32>
    %cst_7 = arith.constant 0.000000e+00 : f32
    %7 = vector.broadcast %cst_7 : f32 to vector<8x128xf32>
    %8 = arith.cmpf oge, %6, %7 : vector<8x128xf32>
    %cst_8 = arith.constant 0.00999999977 : f32
    %9 = vector.broadcast %cst_8 : f32 to vector<8x128xf32>
    %10 = arith.mulf %9, %6 : vector<8x128xf32>
    %11 = arith.select %8, %6, %10 : vector<8x128xi1>, vector<8x128xf32>
    %c0_9 = arith.constant 0 : index
    %c0_10 = arith.constant 0 : index
    %12 = vector.load %arg4[%c0_9, %c0_10] : memref<128x128xf32, #tpu.memory_space<vmem>>, vector<128x128xf32>
    %cst_11 = arith.constant dense<0.000000e+00> : vector<8x128xf32>
    %13 = tpu.matmul %11, %12, %cst_11 {dimension_numbers = #tpu.dot_dimension_numbers<[1], [0], [0], [1], [0, 0, 1, 1], [], []>} : vector<8x128xf32>, vector<128x128xf32>, vector<8x128xf32> -> vector<8x128xf32>
    %14 = vector.broadcast %1 : vector<1x128xf32> to vector<8x128xf32>
    %15 = arith.addf %13, %14 : vector<8x128xf32>
    %16 = arith.negf %15 : vector<8x128xf32>
    %17 = math.exp %16 : vector<8x128xf32>
    %cst_12 = arith.constant 1.000000e+00 : f32
    %18 = vector.broadcast %cst_12 : f32 to vector<8x128xf32>
    %19 = arith.addf %18, %17 : vector<8x128xf32>
    %20 = arith.divf %18, %19 : vector<8x128xf32>
    %c0_13 = arith.constant 0 : index
    %c0_14 = arith.constant 0 : index
    %21 = vector.load %arg6[%c0_13, %c0_14] : memref<8x128xf32, #tpu.memory_space<vmem>>, vector<8x128xf32>
    tpu.vector_store %arg6[%c0_13, %c0_14], %20 {strides = array<i32>} : memref<8x128xf32, #tpu.memory_space<vmem>>, vector<8x128xf32>,
    return
  }
  func.func @transform_0(%arg0: i32) -> (i32, i32) {
    %c0_i32 = arith.constant 0 : i32
    %c0_i32_0 = arith.constant 0 : i32
    return %arg0, %c0_i32 : i32, i32
  }
  func.func @transform_1(%arg0: i32) -> (i32, i32) {
    %c0_i32 = arith.constant 0 : i32
    %c0_i32_0 = arith.constant 0 : i32
    %c0_i32_1 = arith.constant 0 : i32
    return %c0_i32, %c0_i32_0 : i32, i32
  }
  func.func @transform_2(%arg0: i32) -> (i32, i32) {
    %c0_i32 = arith.constant 0 : i32
    %c0_i32_0 = arith.constant 0 : i32
    %c0_i32_1 = arith.constant 0 : i32
    return %c0_i32, %c0_i32_0 : i32, i32
  }
  func.func @transform_3(%arg0: i32) -> (i32, i32) {
    %c0_i32 = arith.constant 0 : i32
    %c0_i32_0 = arith.constant 0 : i32
    %c0_i32_1 = arith.constant 0 : i32
    return %c0_i32, %c0_i32_0 : i32, i32
  }
  func.func @transform_4(%arg0: i32) -> (i32, i32) {
    %c0_i32 = arith.constant 0 : i32
    %c0_i32_0 = arith.constant 0 : i32
    %c0_i32_1 = arith.constant 0 : i32
    return %c0_i32, %c0_i32_0 : i32, i32
  }
  func.func @transform_5(%arg0: i32) -> (i32, i32) {
    %c0_i32 = arith.constant 0 : i32
    %c0_i32_0 = arith.constant 0 : i32
    return %arg0, %c0_i32 : i32, i32
  }
}

</mosaic_0001>

<bundles_post_ra>
// kernel: tpu_custom_call.1
= control target key start
LH: loop header
LB: loop body
LE: loop exit
PB: predicated region body
PF: predicated region fallthrough
CT: control target
= control target key end

     0   :  { %10 = vsyncpa [#allocation3], 0  ;;  %s345_s0 = inlined_call_operand.hbm [shape: f32[8,8], index: 0, kind: input, shape index: {}]   ;;  %s346_s1 = inlined_call_operand.hbm [shape: f32[8,128], index: 1, kind: input, shape index: {}]   ;;  %s347_s2 = inlined_call_operand.vmem [shape: f32[1,128], index: 2, kind: input, shape index: {}]   ;;  %s348_s3 = inlined_call_operand.hbm [shape: f32[128,128], index: 3, kind: input, shape index: {}]   ;;  %s349_s4 = inlined_call_operand.vmem [shape: f32[1,128], index: 4, kind: input, shape index: {}]   ;;  %s350_s5 = inlined_call_operand.hbm [shape: f32[8,128], index: 5, kind: output, shape index: {}]  }
   0x1   :  { %11 = vsyncpa [#allocation6], 0  ;;  %s29_s20 = sshll.u32 %s346_s1, 4  ;;  %s30_s20 = int_to_ptr.hbm [resolvable:$true] %s29_s20 }
   0x2   :  { %12 = vsyncpa [#allocation4], 0  ;;  %s291_s21 = smov [#allocation5]   ;;  %s18_s25 = sshll.u32 %s345_s0, 4  ;;  %s19_s25 = int_to_ptr.hbm [resolvable:$true] %s18_s25 }
   0x3   :  { %s31_s22 = sshll.u32 %s291_s21, 4  ;;  %s292_s26 = smov [#allocation2]   ;;  %s32_s22 = int_to_ptr.vmem [resolvable:$true] %s31_s22 }
   0x4   :  { %34 = dma.hbm_to_vmem [thread:$0]  %s30_s20, 128, %s32_s22, [#allocation6]  }
   0x5   :  { %s20_s27 = sshll.u32 %s292_s26, 4  ;;  %s41_s30 = sshll.u32 %s348_s3, 4  ;;  %s21_s27 = int_to_ptr.vmem [resolvable:$true] %s20_s27  ;;  %s42_s30 = int_to_ptr.hbm [resolvable:$true] %s41_s30 }
   0x6   :  { %23 = dma.hbm_to_vmem [thread:$0]  %s19_s25, 128, %s21_s27, [#allocation3]  }
   0x7   :  { %s293_s1 = smov [#allocation7]   ;;  %s294_s7 = smov 128  }
   0x8   :  { %s43_s6 = sshll.u32 %s293_s1, 4  ;;  %s295_s8 = smov 8   ;;  %s44_s6 = int_to_ptr.vmem [resolvable:$true] %s43_s6 }
   0x9   :  { %49 = dma.hbm_to_vmem [thread:$0]  %s42_s30, 2048, %s44_s6, [#allocation6], %s294_s7, %s294_s7, %s295_s8  }
   0xa   :  { %285 = dma.done.wait [#allocation3], 128  }
   0xb   :  { %286 = vsyncadd [#allocation3], 4294967168 }
   0xc   :  { %287 = dma.done.wait [#allocation6], 2176  }
   0xd   :  { %288 = vsyncadd [#allocation6], 4294965120  ;;  %vm71_vm0 = vcmask 64512   ;;  %v67_v0 = vld [vmem:[#allocation5] sm:$0xff]  ;;  %v66_v1 = vld [vmem:[#allocation2] sm:$0xff] }
   0xe   :  { %v113_v2 = vld [vmem:[#allocation7 + $0x78] sm:$0xff]  ;;  %90 = vmatpush.msra.mxu0 %v67_v0  ;;  %v112_v3 = vld [vmem:[#allocation7 + $0x70] sm:$0xff]  ;;  %v111_v4 = vld [vmem:[#allocation7 + $0x68] sm:$0xff] }
   0xf   :  { %117 = vmatpush.msra.mxu1 %v113_v2  ;;  %175 = vmatmul.msk.f32.vlgmr.msra.gmra.mxu0 %vm71_vm0, %v66_v1  ;;  %v110_v5 = vld [vmem:[#allocation7 + $0x60] sm:$0xff]  ;;  %v109_v6 = vld [vmem:[#allocation7 + $0x58] sm:$0xff]  ;;  %v108_v7 = vld [vmem:[#allocation7 + $0x50] sm:$0xff] }
  0x10   :  { %v107_v8 = vld [vmem:[#allocation7 + $0x48] sm:$0xff]  ;;  %v106_v9 = vld [vmem:[#allocation7 + $0x40] sm:$0xff]  ;;  %v105_v10 = vld [vmem:[#allocation7 + $0x38] sm:$0xff] }
  0x11   :  { %118 = vmatpush.msra.mxu1 %v112_v3  ;;  %v104_v11 = vld [vmem:[#allocation7 + $0x30] sm:$0xff]  ;;  %v103_v12 = vld [vmem:[#allocation7 + $0x28] sm:$0xff]  ;;  %v102_v13 = vld [vmem:[#allocation7 + $0x20] sm:$0xff] }
  0x12   :  { %v101_v14 = vld [vmem:[#allocation7 + $0x18] sm:$0xff]  ;;  %v100_v15 = vld [vmem:[#allocation7 + $0x10] sm:$0xff]  ;;  %v99_v16 = vld [vmem:[#allocation7 + $0x8] sm:$0xff] }
  0x13   :  { %119 = vmatpush.msra.mxu1 %v111_v4  ;;  %v98_v17 = vld [vmem:[#allocation7] sm:$0xff]  ;;  %v183_v18 = vld [vmem:[%s347_s2] ss:$0 sm:$0xff]  ;;  %s296_s2 = smov [#allocation8]  }
  0x14   :  { %v184_v23 = vld [vmem:[%s349_s4] ss:$0 sm:$0xff]  ;;  %s162_s11 = sshll.u32 %s296_s2, 4  ;;  %s164_s4 = sshll.u32 %s350_s5, 4  ;;  %s163_s11 = int_to_ptr.vmem [resolvable:$true] %s162_s11  ;;  %s165_s4 = int_to_ptr.hbm [resolvable:$true] %s164_s4 }
  0x15   :  { %120 = vmatpush.msra.mxu1 %v110_v5 }
  0x17   :  { %121 = vmatpush.msra.mxu1 %v109_v6 }
  0x19   :  { %122 = vmatpush.msra.mxu1 %v108_v7 }
  0x1b   :  { %123 = vmatpush.msra.mxu1 %v107_v8 }
  0x1d   :  { %124 = vmatpush.msra.mxu1 %v106_v9 }
  0x1f   :  { %125 = vmatpush.msra.mxu1 %v105_v10 }
  0x21   :  { %126 = vmatpush.msra.mxu1 %v104_v11 }
  0x23   :  { %127 = vmatpush.msra.mxu1 %v103_v12 }
  0x25   :  { %128 = vmatpush.msra.mxu1 %v102_v13 }
  0x27   :  { %129 = vmatpush.msra.mxu1 %v101_v14 }
  0x29   :  { %130 = vmatpush.msra.mxu1 %v100_v15 }
  0x2b   :  { %131 = vmatpush.msra.mxu1 %v99_v16 }
  0x2d   :  { %132 = vmatpush.msra.mxu1 %v98_v17 }
  0x8c   :  { %v92_v19 = vpop.f32.mrf.mxu0 }
  0x8d   :  { %v93_v20 = vadd.f32 %v183_v18, %v92_v19 }
  0x8f   :  { %vm95_vm1 = vcmp.ge.f32.partialorder %v93_v20, 0.0  ;;  %v96_v21 = vmul.f32 0.01, %v93_v20 }
  0x91   :  { %v97_v22 = vsel %vm95_vm1, %v93_v20, %v96_v21 }
  0x92   :  { %133 = vmatmul.f32.vlgmr.msra.gmra.mxu1 %v97_v22 }
 0x10f   :  { %v134_v24 = vpop.f32.mrf.mxu1 }
 0x110   :  { %v135_v25 = vadd.f32 %v184_v23, %v134_v24 }
 0x112   :  { %v176_v26 = vmul.f32 -1.442695, %v135_v25 }
 0x114   :  { %185 = vpow2.f32 %v176_v26 }
 0x11a   :  { %v186_v27 = vpop.eup %185 }
 0x11b   :  { %v140_v28 = vadd.f32 1.0, %v186_v27 }
 0x11d   :  { %187 = vrcp.f32 %v140_v28  ;;  %v152_v32 = vand.u32 2147483648, %v140_v28  ;;  %v150_v34 = vand.u32 2147483647, %v140_v28  ;;  %vm146_vm3 = vweird.f32 %v140_v28 }
 0x11f   :  { %v153_v36 = vor.u32 1.1754944e-38, %v152_v32  ;;  %vm151_vm5 = vcmp.eq.f32.partialorder %v150_v34, 8.507059e+37 }
 0x123   :  { %v188_v29 = vpop.eup %187 }
 0x124   :  { %v142_v30 = vmul.f32 %v188_v29, %v140_v28  ;;  %vm147_vm2 = vweird.f32 %v188_v29 }
 0x125   :  { %vm148_vm4 = vmor %vm146_vm3, %vm147_vm2 }
 0x126   :  { %v143_v31 = vsub.f32 1.0, %v142_v30 }
 0x128   :  { %v144_v33 = vmul.f32 %v188_v29, %v143_v31 }
 0x12a   :  { %v145_v35 = vadd.f32 %v188_v29, %v144_v33 }
 0x12c   :  { %v149_v37 = vsel %vm148_vm4, %v188_v29, %v145_v35 }
 0x12d   :  { %v154_v38 = vsel %vm151_vm5, %v153_v36, %v149_v37 }
 0x12e   :  { %156 = vst [vmem:[#allocation8] sm:$0xff] %v154_v38 }
 0x12f   :  { %167 = dma.vmem_to_hbm [thread:$0]  %s163_s11, 128, %s165_s4, [#allocation4]  }
 0x130   :  { %289 = dma.done.wait [#allocation4], 128  }
 0x131   :  { %290 = vsyncadd [#allocation4], 4294967168 }
 0x132   :  { %172 = vsyncpa [#allocation3], 1 }
 0x133   :  { %173 = vsyncpa [#allocation6], 1 }
 0x134   :  { %174 = vsyncpa [#allocation4], 1 }

</bundles_post_ra>
